<compile_context>
chip_gen: v7x
topology: tpu7x:2x2x1
jax: 0.10.0
libtpu: 0.0.40
codegen_flags: <defaults>
</compile_context>

<pallas_src>
import functools

import jax
import jax.numpy as jnp
from jax import lax
from jax.experimental import pallas as pl
from jax.experimental.pallas import tpu as pltpu


def _round_up(n, m):
    return ((n + m - 1) // m) * m


def mlp_kernel(x_ref,
               w1_ref, b1_ref,
               w2_ref, b2_ref,
               w3_ref, b3_ref,
               w4_ref, b4_ref,
               w5_ref, b5_ref,
               o_ref,
               *, chunk):
    tb = x_ref.shape[0]
    # Static (fully unrolled) loop over lane chunks of the batch tile: the full
    # 5-layer chain runs per chunk so intermediates live in vregs, not VMEM.
    for c in range(tb // chunk):
        xc = x_ref[pl.ds(c * chunk, chunk), :].astype(jnp.bfloat16)    # (chunk, 32)

        # Layer 1 as a transposed-RHS matmul: (64,32) x (chunk,32)^T -> (64,chunk).
        # Activations are now (features, batch): batch on the 128-wide lane axis.
        h = lax.dot_general(w1_ref[...], xc, (((1,), (1,)), ((), ())),
                            preferred_element_type=jnp.float32) + b1_ref[...]
        h = jnp.maximum(h, 0.0).astype(jnp.bfloat16)                   # (64, chunk)

        h = jnp.dot(w2_ref[...], h, preferred_element_type=jnp.float32) + b2_ref[...]
        h = jnp.maximum(h, 0.0).astype(jnp.bfloat16)                   # (32, chunk)

        h = jnp.dot(w3_ref[...], h, preferred_element_type=jnp.float32) + b3_ref[...]
        h = jnp.maximum(h, 0.0).astype(jnp.bfloat16)                   # (16, chunk)

        h = jnp.dot(w4_ref[...], h, preferred_element_type=jnp.float32) + b4_ref[...]
        h = jnp.maximum(h, 0.0)                                        # (8, chunk) f32

        # Final 8 -> 1 layer on the VPU/XLU (an N=1 MXU pass would be wasted).
        out = jnp.sum(h * w5_ref[...], axis=0, keepdims=True) + b5_ref[...]   # (1, chunk)
        o_ref[:, pl.ds(c * chunk, chunk)] = out.astype(o_ref.dtype)


@functools.partial(jax.jit, static_argnames=("block_batch", "chunk"))
def reinforcement_model_forward(x, params, *, block_batch=8192, chunk=256):
    """x: (B, 32) float32; params: list of (W, b) in PyTorch layout W=(out, in), b=(out,)."""
    B, F = x.shape
    assert F == 32, F

    # Batch tile: lane-dense multiple of 128, large enough to amortize the
    # per-grid-step cost, small enough that the double-buffered x tile plus
    # temporaries stay well inside 32 MiB VMEM on v5e/v6e/v7x.
    TB = min(_round_up(block_batch, 128), _round_up(max(B, 1), 128))
    # Keep >= 2 grid steps for large batches so v7x's second TensorCore engages.
    if B >= 4096 and _round_up(B, TB) // TB < 2:
        TB = _round_up(-(-B // 2), 128)
    # In-kernel chunk must divide TB (both are multiples of 128).
    chunk = min(chunk, TB)
    while TB % chunk:
        chunk //= 2

    B_pad = _round_up(B, TB)
    num_tiles = B_pad // TB
    if B_pad != B:
        x = jnp.pad(x, ((0, B_pad - B), (0, 0)))

    (w1, b1), (w2, b2), (w3, b3), (w4, b4), (w5, b5) = params
    # bf16 matmul operands (f32 accumulation); biases stay f32 as (out, 1)
    # columns; the final 8->1 layer stays f32 on the VPU.
    w1b, w2b, w3b, w4b = (w.astype(jnp.bfloat16) for w in (w1, w2, w3, w4))
    b1c, b2c, b3c, b4c = (b.reshape(-1, 1).astype(jnp.float32) for b in (b1, b2, b3, b4))
    w5c = w5.reshape(-1, 1).astype(jnp.float32)                        # (8, 1)
    b5c = b5.reshape(1, 1).astype(jnp.float32)                         # (1, 1)

    def const_spec(arr):
        # Weights/biases: full block, constant index map -> VMEM-resident across
        # the whole grid (no per-step re-DMA).
        return pl.BlockSpec(arr.shape, lambda i: (0, 0))

    in_specs = [
        pl.BlockSpec((TB, 32), lambda i: (i, 0)),                      # raw f32 rows
        const_spec(w1b), const_spec(b1c),
        const_spec(w2b), const_spec(b2c),
        const_spec(w3b), const_spec(b3c),
        const_spec(w4b), const_spec(b4c),
        const_spec(w5c), const_spec(b5c),
    ]
    # Output as a single (1, B_pad) row: first block dim == full extent (clean
    # layout, no masked sublane writeback), contiguous lane-dense stores.
    out_specs = pl.BlockSpec((1, TB), lambda i: (0, i))

    out = pl.pallas_call(
        functools.partial(mlp_kernel, chunk=chunk),
        out_shape=jax.ShapeDtypeStruct((1, B_pad), jnp.float32),
        grid_spec=pl.GridSpec(grid=(num_tiles,), in_specs=in_specs, out_specs=out_specs),
        compiler_params=pltpu.CompilerParams(
            dimension_semantics=("parallel",),
            vmem_limit_bytes=32 * 1024 * 1024,
        ),
    )(x, w1b, b1c, w2b, b2c, w3b, b3c, w4b, b4c, w5c, b5c)

    return out[0, :B].reshape(B, 1)


def init_params(key):
    """Deterministic init mimicking PyTorch nn.Linear default (uniform +-1/sqrt(fan_in)).

    Weights are kept in the PyTorch (out_features, in_features) layout.
    """
    dims = [(32, 64), (64, 32), (32, 16), (16, 8), (8, 1)]
    params = []
    for fan_in, fan_out in dims:
        kw, kb, key = jax.random.split(key, 3)
        bound = 1.0 / jnp.sqrt(fan_in)
        w = jax.random.uniform(kw, (fan_out, fan_in), jnp.float32, -bound, bound)
        b = jax.random.uniform(kb, (fan_out,), jnp.float32, -bound, bound)
        params.append((w, b))
    return params


def reference_forward(x, params):
    """Pure-JAX reference matching the kernel's numerics (bf16 matmul operands, f32 acc)."""
    h = x.astype(jnp.bfloat16)
    for i, (w, b) in enumerate(params[:-1]):
        h = jnp.dot(h, w.T.astype(jnp.bfloat16), preferred_element_type=jnp.float32) + b
        h = jnp.maximum(h, 0.0)
        if i < 3:
            h = h.astype(jnp.bfloat16)
    w5, b5 = params[-1]
    return jnp.sum(h * w5.reshape(1, -1), axis=-1, keepdims=True) + b5


if __name__ == "__main__":
    key = jax.random.PRNGKey(0)
    kx, kp = jax.random.split(key)
    params = init_params(kp)

    # Small batch; features = 32 as implied by fc1.
    B = 8
    x = jax.random.normal(kx, (B, 32), jnp.float32)
    out = jax.block_until_ready(reinforcement_model_forward(x, params))
    ref = reference_forward(x, params)
    assert out.shape == (B, 1), out.shape
    assert jnp.allclose(out, ref, atol=2e-2, rtol=2e-2), (out, ref)

    # Multi-tile grid + tail-padding path with a small batch tile.
    B2 = 300
    x2 = jax.random.normal(jax.random.PRNGKey(1), (B2, 32), jnp.float32)
    out2 = jax.block_until_ready(
        reinforcement_model_forward(x2, params, block_batch=128))
    ref2 = reference_forward(x2, params)
    assert out2.shape == (B2, 1), out2.shape
    assert jnp.allclose(out2, ref2, atol=2e-2, rtol=2e-2), (out2, ref2)

    # Default (large-tile) path exercising several in-kernel chunks + padding.
    B3 = 600
    x3 = jax.random.normal(jax.random.PRNGKey(2), (B3, 32), jnp.float32)
    out3 = jax.block_until_ready(reinforcement_model_forward(x3, params))
    ref3 = reference_forward(x3, params)
    assert out3.shape == (B3, 1), out3.shape
    assert jnp.allclose(out3, ref3, atol=2e-2, rtol=2e-2), (out3, ref3)

    print("KERNEL_OK")
</pallas_src>

<mosaic_0001>
module attributes {stable_mosaic.version = 11 : i64} {
  func.func @mlp_kernel(%arg0: i32, %arg1: memref<128x32xf32, #tpu.memory_space<vmem>>, %arg2: memref<64x32xbf16, #tpu.memory_space<vmem>>, %arg3: memref<64x1xf32, #tpu.memory_space<vmem>>, %arg4: memref<32x64xbf16, #tpu.memory_space<vmem>>, %arg5: memref<32x1xf32, #tpu.memory_space<vmem>>, %arg6: memref<16x32xbf16, #tpu.memory_space<vmem>>, %arg7: memref<16x1xf32, #tpu.memory_space<vmem>>, %arg8: memref<8x16xbf16, #tpu.memory_space<vmem>>, %arg9: memref<8x1xf32, #tpu.memory_space<vmem>>, %arg10: memref<8x1xf32, #tpu.memory_space<vmem>>, %arg11: memref<1x1xf32, #tpu.memory_space<vmem>>, %arg12: memref<1x128xf32, #tpu.memory_space<vmem>>) attributes {dimension_semantics = [#tpu.dimension_semantics<parallel>], iteration_bounds = array<i64: 1>, scalar_prefetch = 0 : i64, scratch_operands = 0 : i64, tpu.core_type = #tpu.core_type<tc>, window_params = [{transform_indices = @transform_0, window_bounds = array<i64: 128, 32>}, {pipeline_mode = #tpu.pipeline_mode<synchronous>, transform_indices = @transform_1, window_bounds = array<i64: 64, 32>}, {pipeline_mode = #tpu.pipeline_mode<synchronous>, transform_indices = @transform_2, window_bounds = array<i64: 64, 1>}, {pipeline_mode = #tpu.pipeline_mode<synchronous>, transform_indices = @transform_3, window_bounds = array<i64: 32, 64>}, {pipeline_mode = #tpu.pipeline_mode<synchronous>, transform_indices = @transform_4, window_bounds = array<i64: 32, 1>}, {pipeline_mode = #tpu.pipeline_mode<synchronous>, transform_indices = @transform_5, window_bounds = array<i64: 16, 32>}, {pipeline_mode = #tpu.pipeline_mode<synchronous>, transform_indices = @transform_6, window_bounds = array<i64: 16, 1>}, {pipeline_mode = #tpu.pipeline_mode<synchronous>, transform_indices = @transform_7, window_bounds = array<i64: 8, 16>}, {pipeline_mode = #tpu.pipeline_mode<synchronous>, transform_indices = @transform_8, window_bounds = array<i64: 8, 1>}, {pipeline_mode = #tpu.pipeline_mode<synchronous>, transform_indices = @transform_9, window_bounds = array<i64: 8, 1>}, {pipeline_mode = #tpu.pipeline_mode<synchronous>, transform_indices = @transform_10, window_bounds = array<i64: 1, 1>}, {transform_indices = @transform_11, window_bounds = array<i64: 1, 128>}]} {
    %c0 = arith.constant 0 : index
    %c0_0 = arith.constant 0 : index
    %0 = vector.load %arg1[%c0, %c0_0] : memref<128x32xf32, #tpu.memory_space<vmem>>, vector<128x32xf32>
    %1 = arith.truncf %0 : vector<128x32xf32> to vector<128x32xbf16>
    %c0_1 = arith.constant 0 : index
    %c0_2 = arith.constant 0 : index
    %2 = vector.load %arg2[%c0_1, %c0_2] : memref<64x32xbf16, #tpu.memory_space<vmem>>, vector<64x32xbf16>
    %cst = arith.constant dense<0.000000e+00> : vector<64x128xf32>
    %3 = tpu.matmul %2, %1, %cst {dimension_numbers = #tpu.dot_dimension_numbers<[1], [1], [0], [0], [0, 0, 1, 0], [], []>} : vector<64x32xbf16>, vector<128x32xbf16>, vector<64x128xf32> -> vector<64x128xf32>
    %c0_3 = arith.constant 0 : index
    %c0_4 = arith.constant 0 : index
    %4 = vector.load %arg3[%c0_3, %c0_4] : memref<64x1xf32, #tpu.memory_space<vmem>>, vector<64x1xf32>
    %5 = vector.broadcast %4 : vector<64x1xf32> to vector<64x128xf32>
    %6 = arith.addf %3, %5 : vector<64x128xf32>
    %cst_5 = arith.constant 0.000000e+00 : f32
    %7 = vector.broadcast %cst_5 : f32 to vector<64x128xf32>
    %8 = arith.maximumf %6, %7 : vector<64x128xf32>
    %9 = arith.truncf %8 : vector<64x128xf32> to vector<64x128xbf16>
    %c0_6 = arith.constant 0 : index
    %c0_7 = arith.constant 0 : index
    %10 = vector.load %arg4[%c0_6, %c0_7] : memref<32x64xbf16, #tpu.memory_space<vmem>>, vector<32x64xbf16>
    %cst_8 = arith.constant dense<0.000000e+00> : vector<32x128xf32>
    %11 = tpu.matmul %10, %9, %cst_8 {dimension_numbers = #tpu.dot_dimension_numbers<[1], [0], [0], [1], [0, 0, 1, 1], [], []>} : vector<32x64xbf16>, vector<64x128xbf16>, vector<32x128xf32> -> vector<32x128xf32>
    %c0_9 = arith.constant 0 : index
    %c0_10 = arith.constant 0 : index
    %12 = vector.load %arg5[%c0_9, %c0_10] : memref<32x1xf32, #tpu.memory_space<vmem>>, vector<32x1xf32>
    %13 = vector.broadcast %12 : vector<32x1xf32> to vector<32x128xf32>
    %14 = arith.addf %11, %13 : vector<32x128xf32>
    %cst_11 = arith.constant 0.000000e+00 : f32
    %15 = vector.broadcast %cst_11 : f32 to vector<32x128xf32>
    %16 = arith.maximumf %14, %15 : vector<32x128xf32>
    %17 = arith.truncf %16 : vector<32x128xf32> to vector<32x128xbf16>
    %c0_12 = arith.constant 0 : index
    %c0_13 = arith.constant 0 : index
    %18 = vector.load %arg6[%c0_12, %c0_13] : memref<16x32xbf16, #tpu.memory_space<vmem>>, vector<16x32xbf16>
    %cst_14 = arith.constant dense<0.000000e+00> : vector<16x128xf32>
    %19 = tpu.matmul %18, %17, %cst_14 {dimension_numbers = #tpu.dot_dimension_numbers<[1], [0], [0], [1], [0, 0, 1, 1], [], []>} : vector<16x32xbf16>, vector<32x128xbf16>, vector<16x128xf32> -> vector<16x128xf32>
    %c0_15 = arith.constant 0 : index
    %c0_16 = arith.constant 0 : index
    %20 = vector.load %arg7[%c0_15, %c0_16] : memref<16x1xf32, #tpu.memory_space<vmem>>, vector<16x1xf32>
    %21 = vector.broadcast %20 : vector<16x1xf32> to vector<16x128xf32>
    %22 = arith.addf %19, %21 : vector<16x128xf32>
    %cst_17 = arith.constant 0.000000e+00 : f32
    %23 = vector.broadcast %cst_17 : f32 to vector<16x128xf32>
    %24 = arith.maximumf %22, %23 : vector<16x128xf32>
    %25 = arith.truncf %24 : vector<16x128xf32> to vector<16x128xbf16>
    %c0_18 = arith.constant 0 : index
    %c0_19 = arith.constant 0 : index
    %26 = vector.load %arg8[%c0_18, %c0_19] : memref<8x16xbf16, #tpu.memory_space<vmem>>, vector<8x16xbf16>
    %cst_20 = arith.constant dense<0.000000e+00> : vector<8x128xf32>
    %27 = tpu.matmul %26, %25, %cst_20 {dimension_numbers = #tpu.dot_dimension_numbers<[1], [0], [0], [1], [0, 0, 1, 1], [], []>} : vector<8x16xbf16>, vector<16x128xbf16>, vector<8x128xf32> -> vector<8x128xf32>
    %c0_21 = arith.constant 0 : index
    %c0_22 = arith.constant 0 : index
    %28 = vector.load %arg9[%c0_21, %c0_22] : memref<8x1xf32, #tpu.memory_space<vmem>>, vector<8x1xf32>
    %29 = vector.broadcast %28 : vector<8x1xf32> to vector<8x128xf32>
    %30 = arith.addf %27, %29 : vector<8x128xf32>
    %cst_23 = arith.constant 0.000000e+00 : f32
    %31 = vector.broadcast %cst_23 : f32 to vector<8x128xf32>
    %32 = arith.maximumf %30, %31 : vector<8x128xf32>
    %c0_24 = arith.constant 0 : index
    %c0_25 = arith.constant 0 : index
    %33 = vector.load %arg10[%c0_24, %c0_25] : memref<8x1xf32, #tpu.memory_space<vmem>>, vector<8x1xf32>
    %34 = vector.broadcast %33 : vector<8x1xf32> to vector<8x128xf32>
    %35 = arith.mulf %32, %34 : vector<8x128xf32>
    %cst_26 = arith.constant dense<0.000000e+00> : vector<128xf32>
    %36 = vector.multi_reduction <add>, %35, %cst_26 [0] : vector<8x128xf32> to vector<128xf32>
    %37 = vector.shape_cast %36 : vector<128xf32> to vector<1x128xf32>
    %c0_27 = arith.constant 0 : index
    %c0_28 = arith.constant 0 : index
    %38 = vector.load %arg11[%c0_27, %c0_28] : memref<1x1xf32, #tpu.memory_space<vmem>>, vector<1x1xf32>
    %39 = vector.broadcast %38 : vector<1x1xf32> to vector<1x128xf32>
    %40 = arith.addf %37, %39 : vector<1x128xf32>
    %c0_29 = arith.constant 0 : index
    %c0_30 = arith.constant 0 : index
    %41 = vector.load %arg12[%c0_29, %c0_30] : memref<1x128xf32, #tpu.memory_space<vmem>>, vector<1x128xf32>
    tpu.vector_store %arg12[%c0_29, %c0_30], %40 {strides = array<i32>} : memref<1x128xf32, #tpu.memory_space<vmem>>, vector<1x128xf32>,
    return
  }
  func.func @transform_0(%arg0: i32) -> (i32, i32) {
    %c0_i32 = arith.constant 0 : i32
    %c0_i32_0 = arith.constant 0 : i32
    return %arg0, %c0_i32 : i32, i32
  }
  func.func @transform_1(%arg0: i32) -> (i32, i32) {
    %c0_i32 = arith.constant 0 : i32
    %c0_i32_0 = arith.constant 0 : i32
    %c0_i32_1 = arith.constant 0 : i32
    return %c0_i32, %c0_i32_0 : i32, i32
  }
  func.func @transform_2(%arg0: i32) -> (i32, i32) {
    %c0_i32 = arith.constant 0 : i32
    %c0_i32_0 = arith.constant 0 : i32
    %c0_i32_1 = arith.constant 0 : i32
    return %c0_i32, %c0_i32_0 : i32, i32
  }
  func.func @transform_3(%arg0: i32) -> (i32, i32) {
    %c0_i32 = arith.constant 0 : i32
    %c0_i32_0 = arith.constant 0 : i32
    %c0_i32_1 = arith.constant 0 : i32
    return %c0_i32, %c0_i32_0 : i32, i32
  }
  func.func @transform_4(%arg0: i32) -> (i32, i32) {
    %c0_i32 = arith.constant 0 : i32
    %c0_i32_0 = arith.constant 0 : i32
    %c0_i32_1 = arith.constant 0 : i32
    return %c0_i32, %c0_i32_0 : i32, i32
  }
  func.func @transform_5(%arg0: i32) -> (i32, i32) {
    %c0_i32 = arith.constant 0 : i32
    %c0_i32_0 = arith.constant 0 : i32
    %c0_i32_1 = arith.constant 0 : i32
    return %c0_i32, %c0_i32_0 : i32, i32
  }
  func.func @transform_6(%arg0: i32) -> (i32, i32) {
    %c0_i32 = arith.constant 0 : i32
    %c0_i32_0 = arith.constant 0 : i32
    %c0_i32_1 = arith.constant 0 : i32
    return %c0_i32, %c0_i32_0 : i32, i32
  }
  func.func @transform_7(%arg0: i32) -> (i32, i32) {
    %c0_i32 = arith.constant 0 : i32
    %c0_i32_0 = arith.constant 0 : i32
    %c0_i32_1 = arith.constant 0 : i32
    return %c0_i32, %c0_i32_0 : i32, i32
  }
  func.func @transform_8(%arg0: i32) -> (i32, i32) {
    %c0_i32 = arith.constant 0 : i32
    %c0_i32_0 = arith.constant 0 : i32
    %c0_i32_1 = arith.constant 0 : i32
    return %c0_i32, %c0_i32_0 : i32, i32
  }
  func.func @transform_9(%arg0: i32) -> (i32, i32) {
    %c0_i32 = arith.constant 0 : i32
    %c0_i32_0 = arith.constant 0 : i32
    %c0_i32_1 = arith.constant 0 : i32
    return %c0_i32, %c0_i32_0 : i32, i32
  }
  func.func @transform_10(%arg0: i32) -> (i32, i32) {
    %c0_i32 = arith.constant 0 : i32
    %c0_i32_0 = arith.constant 0 : i32
    %c0_i32_1 = arith.constant 0 : i32
    return %c0_i32, %c0_i32_0 : i32, i32
  }
  func.func @transform_11(%arg0: i32) -> (i32, i32) {
    %c0_i32 = arith.constant 0 : i32
    %c0_i32_0 = arith.constant 0 : i32
    return %c0_i32, %arg0 : i32, i32
  }
}

</mosaic_0001>

<bundles_post_ra>
// kernel: reinforcement_model_forward.1
= control target key start
LH: loop header
LB: loop body
LE: loop exit
PB: predicated region body
PF: predicated region fallthrough
CT: control target
= control target key end

     0   :  { %vm141_vm0 = vcmask 261120   ;;  %v610_v3 = vmov 0   ;;  %vm293_vm1 = vcmask 523264   ;;  %vm612_vm2 = vmmov 0   ;;  %s824_s0 = inlined_call_operand.vmem [shape: f32[128,32], index: 0, kind: input, shape index: {}]   ;;  %s825_s10 = inlined_call_operand.<no memory space> [shape: f32[1,1], index: 10, kind: input, shape index: {}]   ;;  %s826_s1 = inlined_call_operand.vmem [shape: bf16[64,32], index: 1, kind: input, shape index: {}]   ;;  %s827_s2 = inlined_call_operand.vmem [shape: f32[64,1], index: 2, kind: input, shape index: {}]   ;;  %s828_s4 = inlined_call_operand.vmem [shape: f32[32,1], index: 4, kind: input, shape index: {}]   ;;  %s829_s6 = inlined_call_operand.vmem [shape: f32[16,1], index: 6, kind: input, shape index: {}]   ;;  %s830_s8 = inlined_call_operand.vmem [shape: f32[8,1], index: 8, kind: input, shape index: {}]   ;;  %s831_s9 = inlined_call_operand.vmem [shape: f32[8,1], index: 9, kind: input, shape index: {}]   ;;  %s832_s3 = inlined_call_operand.vmem [shape: bf16[32,64], index: 3, kind: input, shape index: {}]   ;;  %s833_s5 = inlined_call_operand.vmem [shape: bf16[16,32], index: 5, kind: input, shape index: {}]   ;;  %s834_s7 = inlined_call_operand.vmem [shape: bf16[8,16], index: 7, kind: input, shape index: {}]   ;;  %s835_s11 = inlined_call_operand.vmem [shape: f32[1,128], index: 11, kind: output, shape index: {}]  }
   0x1   :  { %v41_v0 = vld [vmem:[%s824_s0] sm:$0xff]  ;;  %v42_v1 = vld [vmem:[%s824_s0 + $0x8] sm:$0xff]  ;;  %v43_v2 = vld [vmem:[%s824_s0 + $0x10] sm:$0xff]  ;;  %601 = vset.pattern.permute.xlu0 %v610_v3  ;;  %602 = vset.pattern.permute.xlu1 %v610_v3  ;;  %v16_v4 = vstv %s825_s10  ;;  %vm428_vm3 = vcmask 130048  }
   0x2   :  { %v57_v5 = vpack.c.bf16 %v42_v1, %v41_v0  ;;  %v44_v6 = vld [vmem:[%s824_s0 + $0x18] sm:$0xff]  ;;  %17 = vst [vmem:[#allocation2] sm:$0x1] %v16_v4  ;;  %v45_v9 = vld [vmem:[%s824_s0 + $0x20] sm:$0xff]  ;;  %v46_v10 = vld [vmem:[%s824_s0 + $0x28] sm:$0xff] }
   0x3   :  { %v58_v7 = vpack.c.bf16 %v44_v6, %v43_v2  ;;  %v603_v11 = vld [vmem:[%s826_s1] sm:$0xff]   ;;  %v59_v13 = vpack.c.bf16 %v46_v10, %v45_v9  ;;  %v75_v15 = vld [vmem:[%s827_s2 + $0x10] sm:$0xff]  ;;  %v74_v16 = vld [vmem:[%s827_s2 + $0x8] sm:$0xff] }
   0x4   :  { %590 = vmatprep.subr.msk.bf16.mxu0 %vm141_vm0, %v57_v5  ;;  %v155_v8 = vsel %vm141_vm0, %v57_v5, 0  ;;  %556 = vmatprep.mubr.msk.bf16.mxu0 %vm141_vm0, %v603_v11  ;;  %v73_v14 = vld [vmem:[%s827_s2] sm:$0xff]  ;;  %v76_v17 = vld [vmem:[%s827_s2 + $0x18] sm:$0xff]  ;;  %v47_v18 = vld [vmem:[%s824_s0 + $0x30] sm:$0xff] }
   0x5   :  { %541 = vmatpush3.bf16.xpose.msra.mxu0 %v155_v8  ;;  %v158_v12 = vsel %vm141_vm0, %v58_v7, 0  ;;  %83 = vperm.xlu0 %601, %v73_v14   ;;  %v48_v19 = vld [vmem:[%s824_s0 + $0x38] sm:$0xff]  ;;  %v77_v20 = vld [vmem:[%s827_s2 + $0x20] sm:$0xff]  ;;  %v78_v21 = vld [vmem:[%s827_s2 + $0x28] sm:$0xff]  ;;  %v161_v22 = vsel %vm141_vm0, %v59_v13, 0 }
   0x6   :  { %591 = vmatprep.subr.msk.bf16.mxu0 %vm141_vm0, %v58_v7  ;;  %93 = vperm.xlu1 %602, %v75_v15   ;;  %v60_v23 = vpack.c.bf16 %v48_v19, %v47_v18  ;;  %v79_v24 = vld [vmem:[%s827_s2 + $0x30] sm:$0xff]  ;;  %v80_v25 = vld [vmem:[%s827_s2 + $0x38] sm:$0xff]  ;;  %v49_v26 = vld [vmem:[%s824_s0 + $0x40] sm:$0xff] }
   0x7   :  { %v50_v27 = vld [vmem:[%s824_s0 + $0x48] sm:$0xff]  ;;  %v259_v28 = vld [vmem:[%s828_s4] sm:$0xff]  ;;  %v261_v32 = vld [vmem:[%s828_s4 + $0x10] sm:$0xff] }
   0x8   :  { %v260_v29 = vld [vmem:[%s828_s4 + $0x8] sm:$0xff]  ;;  %v164_v30 = vsel %vm141_vm0, %v60_v23, 0  ;;  %v61_v31 = vpack.c.bf16 %v50_v27, %v49_v26  ;;  %v262_v33 = vld [vmem:[%s828_s4 + $0x18] sm:$0xff]  ;;  %v51_v34 = vld [vmem:[%s824_s0 + $0x50] sm:$0xff] }
   0x9   :  { %88 = vperm.xlu0 %601, %v74_v16   ;;  %v52_v35 = vld [vmem:[%s824_s0 + $0x58] sm:$0xff]  ;;  %v357_v36 = vld [vmem:[%s829_s6] sm:$0xff]  ;;  %v358_v37 = vld [vmem:[%s829_s6 + $0x8] sm:$0xff] }
   0xa   :  { %98 = vperm.xlu1 %602, %v76_v17   ;;  %v167_v38 = vsel %vm141_vm0, %v61_v31, 0  ;;  %v62_v39 = vpack.c.bf16 %v52_v35, %v51_v34  ;;  %v422_v40 = vld [vmem:[%s830_s8] sm:$0xff]  ;;  %v54_v43 = vld [vmem:[%s824_s0 + $0x68] sm:$0xff]  ;;  %v55_v47 = vld [vmem:[%s824_s0 + $0x70] sm:$0xff] }
   0xb   :  { %v473_v41 = vld [vmem:[%s831_s9] sm:$0xff]  ;;  %v56_v48 = vld [vmem:[%s824_s0 + $0x78] sm:$0xff]  ;;  %v604_v52 = vld [vmem:[%s826_s1 + $0x8] sm:$0xff]  }
   0xc   :  { %v53_v42 = vld [vmem:[%s824_s0 + $0x60] sm:$0xff]  ;;  %v170_v45 = vsel %vm141_vm0, %v62_v39, 0  ;;  %v64_v50 = vpack.c.bf16 %v56_v48, %v55_v47  ;;  %v605_v53 = vld [vmem:[%s826_s1 + $0x10] sm:$0xff]   ;;  %v606_v54 = vld [vmem:[%s826_s1 + $0x18] sm:$0xff]  }
   0xd   :  { %543 = vmatpush3.bf16.xpose.msra.mxu0 %v158_v12  ;;  %103 = vperm.xlu0 %601, %v77_v20   ;;  %v486_v44 = vld [vmem:[#allocation2] sm:$0x1]  ;;  %v63_v46 = vpack.c.bf16 %v54_v43, %v53_v42 }
   0xe   :  { %592 = vmatprep.subr.msk.bf16.mxu0 %vm141_vm0, %v59_v13  ;;  %108 = vperm.xlu1 %602, %v78_v21   ;;  %v176_v51 = vsel %vm141_vm0, %v64_v50, 0  ;;  %v607_v55 = vld [vmem:[%s832_s3] sm:$0xff]  }
   0xf   :  { %v173_v49 = vsel %vm141_vm0, %v63_v46, 0  ;;  %572 = vmatprep.mubr.msk.bf16.mxu1 %vm293_vm1, %v607_v55  ;;  %v609_v48 = vld [vmem:[%s833_s5] sm:$0xff]  }
  0x11   :  { %113 = vperm.xlu0 %601, %v79_v24  }
  0x12   :  { %118 = vperm.xlu1 %602, %v80_v25  }
  0x15   :  { %545 = vmatpush3.bf16.xpose.msra.mxu0 %v161_v22  ;;  %265 = vperm.xlu0 %601, %v259_v28   ;;  %v608_v28 = vld [vmem:[%s832_s3 + $0x8] sm:$0xff]  }
  0x16   :  { %593 = vmatprep.subr.msk.bf16.mxu0 %vm141_vm0, %v60_v23  ;;  %270 = vperm.xlu1 %602, %v260_v29   ;;  %v611_v29 = vmov 0.0  }
  0x19   :  { %275 = vperm.xlu0 %601, %v261_v32  }
  0x1a   :  { %280 = vperm.xlu1 %602, %v262_v33  }
  0x1d   :  { %547 = vmatpush3.bf16.xpose.msra.mxu0 %v164_v30  ;;  %361 = vperm.xlu0 %601, %v357_v36  }
  0x1e   :  { %594 = vmatprep.subr.msk.bf16.mxu0 %vm141_vm0, %v61_v31  ;;  %366 = vperm.xlu1 %602, %v358_v37  }
  0x21   :  { %425 = vperm.xlu0 %601, %v422_v40  }
  0x22   :  { %476 = vperm.xlu1 %602, %v473_v41  }
  0x25   :  { %549 = vmatpush3.bf16.xpose.msra.mxu0 %v167_v38  ;;  %489 = vperm.xlu0 %601, %v486_v44  }
  0x26   :  { %595 = vmatprep.subr.msk.bf16.mxu0 %vm141_vm0, %v62_v39 }
  0x2d   :  { %551 = vmatpush3.bf16.xpose.msra.mxu0 %v170_v45 }
  0x2e   :  { %596 = vmatprep.subr.msk.bf16.mxu0 %vm141_vm0, %v63_v46 }
  0x35   :  { %553 = vmatpush3.bf16.xpose.msra.mxu0 %v173_v49 }
  0x36   :  { %597 = vmatprep.subr.msk.bf16.mxu0 %vm141_vm0, %v64_v50 }
  0x3d   :  { %555 = vmatpush3.bf16.xpose.msra.mxu0 %v176_v51 }
  0x44   :  { %557 = vmatmul.mubr.msk.bf16.vlgmr.msra.gmra.mrb[0].mxu0 %vm141_vm0, %v604_v52 }
  0x45   :  { %560 = vmatprep.mubr.msk.bf16.mxu0 %vm141_vm0, %v605_v53 }
  0x4c   :  { %561 = vmatmul.mubr.msk.bf16.gmra.mrb[4].mxu0 %vm141_vm0, %v606_v54 }
  0x84   :  { %v84_v56 = vpop.permute.xlu0 %83 }
  0x85   :  { %v94_v57 = vpop.permute.xlu1 %93 }
  0x88   :  { %v89_v58 = vpop.permute.xlu0 %88 }
  0x89   :  { %v99_v59 = vpop.permute.xlu1 %98 }
  0x8c   :  { %v104_v63 = vpop.permute.xlu0 %103 }
  0x8d   :  { %v109_v4 = vpop.permute.xlu1 %108 }
  0x90   :  { %v114_v11 = vpop.permute.xlu0 %113 }
  0x91   :  { %v119_v16 = vpop.permute.xlu1 %118 }
  0x94   :  { %v266_v30 = vpop.permute.xlu0 %265 }
  0x95   :  { %v271_v31 = vpop.permute.xlu1 %270 }
  0x98   :  { %v276_v32 = vpop.permute.xlu0 %275 }
  0x99   :  { %v281_v36 = vpop.permute.xlu1 %280 }
  0x9c   :  { %v362_v49 = vpop.permute.xlu0 %361 }
  0x9d   :  { %v367_v53 = vpop.permute.xlu1 %366 }
 0x117   :  { %v558_v60 = vpop.f32.mrb[0].mxu0 }
 0x118   :  { %v221_v61 = vadd.f32 %v558_v60, %v94_v57  ;;  %v212_v62 = vpop.f32.mrb[1].mxu0  ;;  %v421_v60 = vld [vmem:[%s834_s7] sm:$0xf] }
 0x119   :  { %v213_v0 = vadd.f32 %v212_v62, %v84_v56  ;;  %v559_v1 = vpop.f32.mrb[2].mxu0 }
 0x11a   :  { %v224_v2 = vadd.f32 %v559_v1, %v99_v59  ;;  %v215_v3 = vpop.f32.mrb[3].mxu0  ;;  %v245_v6 = vmax.f32 %v221_v61, 0.0  ;;  %v426_v61 = vpop.permute.xlu0 %425 }
 0x11b   :  { %v216_v5 = vadd.f32 %v215_v3, %v89_v58  ;;  %v243_v8 = vmax.f32 %v213_v0, 0.0 }
 0x11c   :  { %v246_v7 = vmax.f32 %v224_v2, 0.0 }
 0x11d   :  { %v244_v9 = vmax.f32 %v216_v5, 0.0  ;;  %v492_v5 = vlaneseq }
 0x11e   :  { %v252_v10 = vpack.c.bf16 %v246_v7, %v245_v6 }
 0x11f   :  { %v562_v12 = vpop.f32.mrb[4].mxu0  ;;  %v251_v13 = vpack.c.bf16 %v244_v9, %v243_v8  ;;  %v493_v8 = vshrl.u32 %v492_v5, 7 }
 0x120   :  { %v237_v14 = vadd.f32 %v562_v12, %v114_v11  ;;  %v228_v15 = vpop.f32.mrb[5].mxu0 }
 0x121   :  { %v229_v17 = vadd.f32 %v228_v15, %v104_v63  ;;  %v563_v18 = vpop.f32.mrb[6].mxu0  ;;  %564 = vmatprep.subr.bf16.mxu1 %v251_v13  ;;  %v494_v11 = vsub.s32 0, %v493_v8 }
 0x122   :  { %v240_v19 = vadd.f32 %v563_v18, %v119_v16  ;;  %v231_v20 = vpop.f32.mrb[7].mxu0  ;;  %565 = vmatpush3.bf16.msra.mxu1 %v251_v13  ;;  %v249_v22 = vmax.f32 %v237_v14, 0.0  ;;  %v490_v13 = vpop.permute.xlu0 %489 }
 0x123   :  { %v232_v21 = vadd.f32 %v231_v20, %v109_v4  ;;  %566 = vmatprep.subr.bf16.mxu1 %v252_v10  ;;  %v247_v24 = vmax.f32 %v229_v17, 0.0  ;;  %v477_v4 = vpop.permute.xlu1 %476  ;;  %v495_v15 = vrot.slane %v490_v13, %v494_v11 }
 0x124   :  { %v250_v23 = vmax.f32 %v240_v19, 0.0 }
 0x125   :  { %v248_v25 = vmax.f32 %v232_v21, 0.0 }
 0x126   :  { %v254_v26 = vpack.c.bf16 %v250_v23, %v249_v22  ;;  %567 = vmatpush3.bf16.msra.mxu1 %v252_v10 }
 0x127   :  { %v253_v27 = vpack.c.bf16 %v248_v25, %v247_v24 }
 0x129   :  { %568 = vmatprep.subr.bf16.mxu1 %v253_v27 }
 0x12a   :  { %569 = vmatpush3.bf16.msra.mxu1 %v253_v27 }
 0x12b   :  { %570 = vmatprep.subr.bf16.mxu1 %v254_v26 }
 0x12e   :  { %571 = vmatpush3.bf16.msra.mxu1 %v254_v26 }
 0x12f   :  { %576 = vmatprep.subr.bf16.mxu1 %v611_v29 }
 0x131   :  { %573 = vmatmul.mubr.msk.bf16.vlgmr.msra.gmra.mrb[0].mxu1 %vm293_vm1, %v608_v28 }
 0x132   :  { %580 = vmatprep.mubr.msk.bf16.mxu1 %vm612_vm2, %v611_v29 }
 0x204   :  { %v574_v33 = vpop.f32.mrb[0].mxu1 }
 0x205   :  { %v343_v34 = vadd.f32 %v574_v33, %v276_v32  ;;  %v334_v35 = vpop.f32.mrb[1].mxu1 }
 0x206   :  { %v335_v37 = vadd.f32 %v334_v35, %v266_v30  ;;  %v575_v38 = vpop.f32.mrb[2].mxu1 }
 0x207   :  { %v346_v39 = vadd.f32 %v575_v38, %v281_v36  ;;  %v337_v40 = vpop.f32.mrb[3].mxu1  ;;  %v351_v42 = vmax.f32 %v343_v34, 0.0 }
 0x208   :  { %v338_v41 = vadd.f32 %v337_v40, %v271_v31  ;;  %v349_v44 = vmax.f32 %v335_v37, 0.0 }
 0x209   :  { %v352_v43 = vmax.f32 %v346_v39, 0.0 }
 0x20a   :  { %v350_v45 = vmax.f32 %v338_v41, 0.0 }
 0x20b   :  { %v354_v46 = vpack.c.bf16 %v352_v43, %v351_v42 }
 0x20c   :  { %v353_v47 = vpack.c.bf16 %v350_v45, %v349_v44 }
 0x20e   :  { %577 = vmatpush3.bf16.msra.mxu1 %v353_v47 }
 0x20f   :  { %578 = vmatprep.subr.bf16.mxu1 %v611_v29 }
 0x212   :  { %579 = vmatpush3.bf16.msra.mxu1 %v354_v46 }
 0x213   :  { %584 = vmatprep.subr.bf16.mxu1 %v611_v29 }
 0x215   :  { %581 = vmatmul.mubr.msk.bf16.vlgmr.msra.gmra.mrb[4].mxu1 %vm141_vm0, %v609_v48 }
 0x216   :  { %586 = vmatprep.mubr.msk.bf16.mxu1 %vm612_vm2, %v611_v29 }
 0x2e8   :  { %v411_v50 = vpop.f32.mrb[4].mxu1 }
 0x2e9   :  { %v412_v51 = vadd.f32 %v411_v50, %v362_v49  ;;  %v582_v52 = vpop.f32.mrb[5].mxu1 }
 0x2ea   :  { %v414_v54 = vpop.f32.mrb[6].mxu1 }
 0x2eb   :  { %v415_v55 = vadd.f32 %v414_v54, %v367_v53  ;;  %v583_v56 = vpop.f32.mrb[7].mxu1  ;;  %v418_v57 = vmax.f32 %v412_v51, 0.0 }
 0x2ed   :  { %v419_v58 = vmax.f32 %v415_v55, 0.0 }
 0x2ef   :  { %v420_v59 = vpack.c.bf16 %v419_v58, %v418_v57 }
 0x2f1   :  { %585 = vmatpush3.bf16.msra.mxu1 %v420_v59 }
 0x2f4   :  { %587 = vmatmul.mubr.msk.bf16.vlgmr.msra.gmra.mrb[8].mxu1 %vm428_vm3, %v421_v60 }
 0x3c7   :  { %v466_v62 = vpop.f32.mrb[8].mxu1 }
 0x3c8   :  { %v467_v63 = vadd.f32 %v466_v62, %v426_v61  ;;  %v588_v0 = vpop.f32.mrb[9].mxu1 }
 0x3c9   :  { %v469_v1 = vpop.f32.mrb[10].mxu1 }
 0x3ca   :  { %v472_v2 = vmax.f32 %v467_v63, 0.0  ;;  %v589_v3 = vpop.f32.mrb[11].mxu1 }
 0x3cc   :  { %v479_v6 = vmul.f32 %v477_v4, %v472_v2 }
 0x3ce   :  { %v480_v7 = vrot.slane %v479_v6, 4 }
 0x3d0   :  { %v481_v9 = vadd.f32 %v480_v7, %v479_v6 }
 0x3d2   :  { %v482_v10 = vrot.slane %v481_v9, 2 }
 0x3d4   :  { %v483_v12 = vadd.f32 %v482_v10, %v481_v9 }
 0x3d6   :  { %v484_v14 = vrot.slane %v483_v12, 1 }
 0x3d8   :  { %v485_v16 = vadd.f32 %v484_v14, %v483_v12 }
 0x3da   :  { %v496_v17 = vadd.f32 %v495_v15, %v485_v16 }
 0x3dc   :  { %497 = vst [vmem:[%s835_s11] sm:$0x1] %v496_v17 }

</bundles_post_ra>
